<compile_context>
chip_gen: v5e
topology: v5e:2x2
jax: 0.10.0
libtpu: 0.0.40
codegen_flags: <defaults>
</compile_context>

<pallas_src>
import functools

import jax
import jax.numpy as jnp
from jax.experimental import pallas as pl
from jax.experimental.pallas import tpu as pltpu

_MIB = 1024 * 1024


def _round_up(v, m):
    return (v + m - 1) // m * m


# --------------------------------------------------------------------------- kernel
def latent_mlp_kernel(x_ref, b0_ref, w0_ref, w1_ref, b1_ref,
                      w2_ref, b2_ref, wo_ref, bo_ref, out_ref, acc_ref):
    """Grid = (batch_tiles, k_tiles).  The trailing k axis accumulates x @ w0 into a
    f32 VMEM scratch; the last k step adds the (time-embedding-folded) layer-0 bias,
    applies ReLU, runs the three remaining resident-weight matmuls and stores a
    lane-dense bf16 output tile."""
    f32, bf16 = jnp.float32, jnp.bfloat16
    k = pl.program_id(1)

    @pl.when(k == 0)
    def _init():
        acc_ref[...] = jnp.zeros_like(acc_ref)

    # Layer-0 partial product.  The activation tile is cast to bf16 HERE, so the
    # wrapper never materializes a bf16 copy of x in HBM.
    acc_ref[...] += jnp.dot(x_ref[...].astype(bf16), w0_ref[...],
                            preferred_element_type=f32)

    @pl.when(k == pl.num_programs(1) - 1)
    def _finalize():
        # Dropout is identity in eval mode; ReLU epilogue in f32.
        h = jnp.maximum(acc_ref[...] + b0_ref[...].astype(f32), 0.0)
        h = jnp.dot(h.astype(bf16), w1_ref[...], preferred_element_type=f32) + b1_ref[...]
        h = jnp.maximum(h, 0.0)
        h = jnp.dot(h.astype(bf16), w2_ref[...], preferred_element_type=f32) + b2_ref[...]
        h = jnp.maximum(h, 0.0)
        out = jnp.dot(h.astype(bf16), wo_ref[...], preferred_element_type=f32) + bo_ref[...]
        out_ref[...] = out.astype(out_ref.dtype)


# ----------------------------------------------------------------- feature probing
def _probe_kernel(x_ref, o_ref):
    o_ref[...] = x_ref[...] + 1.0


@functools.lru_cache(maxsize=1)
def _single_buffer_ok():
    """Probe whether this Pallas build accepts pipeline_mode=pl.Buffered(1) for
    constant-index blocks (halves resident-weight VMEM). Falls back cleanly."""
    if not hasattr(pl, "Buffered"):
        return False
    try:
        fn = pl.pallas_call(
            _probe_kernel,
            out_shape=jax.ShapeDtypeStruct((8, 128), jnp.float32),
            grid=(1, 2),
            in_specs=[pl.BlockSpec((8, 128), lambda i, k: (0, 0),
                                   pipeline_mode=pl.Buffered(1))],
            out_specs=pl.BlockSpec((8, 128), lambda i, k: (0, 0)),
        )
        out = jax.block_until_ready(fn(jnp.zeros((8, 128), jnp.float32)))
        return bool(jnp.allclose(out, 1.0))
    except Exception:  # any failure -> default double buffering
        return False


def _const_spec(shape, single_buffer):
    """BlockSpec for a VMEM-resident (block-index-invariant) operand."""
    if single_buffer:
        return pl.BlockSpec(shape, lambda i, k: (0, 0), pipeline_mode=pl.Buffered(1))
    return pl.BlockSpec(shape, lambda i, k: (0, 0))


# ------------------------------------------------------------------ tiling / VMEM
def _plan(B, D, HP, NP, rowwise_b0, single_buffer):
    """Pick (TB, TK, vmem_limit_bytes) from an honest per-buffer VMEM estimate."""
    try:
        vmem_cap = pltpu.get_tpu_info().vmem_capacity_bytes
    except Exception:
        vmem_cap = 64 * _MIB              # conservative fallback (v7x per-core VMEM)
    budget = int(vmem_cap * 0.85)         # 10-15% headroom for compiler scratch

    wt_bufs = 1 if single_buffer else 2

    def est(tb, tk):
        nk = pl.cdiv(D, tk)
        w0_bufs = wt_bufs if nk == 1 else 2            # streamed over K => 2 buffers
        e = tk * HP * 2 * w0_bufs                      # w0 block(s), bf16
        e += (2 * HP * HP + HP * NP) * 2 * wt_bufs     # w1, w2, wo (bf16, resident)
        e += (2 * 8 * HP + 8 * NP) * 4 * wt_bufs       # b1, b2, bo (f32, sublane-pad)
        if rowwise_b0:
            e += tb * HP * 2 * 2                       # per-row folded bias (bf16)
        else:
            e += 8 * HP * 4 * wt_bufs                  # (1, HP) f32 constant bias
        e += tb * tk * 4 * 2                           # x tiles (f32 stream, 2 bufs)
        e += tb * NP * 2 * 2                           # bf16 output tiles (2 bufs)
        e += tb * HP * 4                               # f32 accumulator scratch
        return e

    # Batch tile: big tiles amortize the ~0.35us per-step overhead; when B > 256
    # guarantee >=2 tiles so the "parallel" axis feeds both TensorCores on v7x.
    TB = min(1024, _round_up(B, 8))
    if B > 256:
        TB = min(TB, _round_up(pl.cdiv(B, 2), 8))

    # K tile: keep w0 fully resident when it fits the budget; otherwise stream it
    # over a trailing "arbitrary" K axis (concrete trigger for the v7x 64 MiB case).
    TK = D
    while est(TB, TK) > budget and TK > 512:
        TK = _round_up(TK // 2, 128)
    while est(TB, TK) > budget and TB > 64:
        TB = _round_up(TB // 2, 8)

    vmem_limit = int(max(32 * _MIB, min(est(TB, TK) + 4 * _MIB, budget)))
    return TB, TK, vmem_limit


# ------------------------------------------------------------------------- params
def init_params(key, input_channels, input_size, hidden_dim, num_classes):
    """PyTorch-like uniform(-1/sqrt(fan_in), +1/sqrt(fan_in)) init, weights (in, out)."""
    input_dim = input_channels * input_size * input_size

    def linear(k, fan_in, fan_out):
        kw, kb = jax.random.split(k)
        bound = 1.0 / jnp.sqrt(jnp.float32(fan_in))
        w = jax.random.uniform(kw, (fan_in, fan_out), jnp.float32, -bound, bound)
        b = jax.random.uniform(kb, (1, fan_out), jnp.float32, -bound, bound)
        return w, b

    keys = jax.random.split(key, 6)
    tw1, tb1 = linear(keys[0], 1, hidden_dim)                      # TimeEmbedding.linear1
    tw2, tb2 = linear(keys[1], hidden_dim, hidden_dim)             # TimeEmbedding.linear2
    w0, b0 = linear(keys[2], input_dim + hidden_dim, hidden_dim)   # layer 0 (on concat)
    w1, b1 = linear(keys[3], hidden_dim, hidden_dim)               # layer 1
    w2, b2 = linear(keys[4], hidden_dim, hidden_dim)               # layer 2
    wo, bo = linear(keys[5], hidden_dim, num_classes)              # output head

    return dict(
        tw1=tw1, tb1=tb1, tw2=tw2, tb2=tb2,
        w0x=w0[:input_dim], w0t=w0[input_dim:], b0=b0,
        w1=w1, b1=b1, w2=w2, b2=b2,
        wo=wo, bo=bo,
    )


# ------------------------------------------------------------------------ forward
@functools.partial(jax.jit, static_argnames=("num_classes", "single_buffer"))
def _latent_mlp_forward_impl(x, t, params, num_classes, single_buffer):
    f32, bf16 = jnp.float32, jnp.bfloat16
    B = x.shape[0]
    input_dim = params["w0x"].shape[0]
    hidden = params["w1"].shape[0]

    x_flat = x.reshape(B, -1)                               # x.view(B, -1); no copy
    if x_flat.shape[1] != input_dim:
        raise ValueError("x does not match input_channels * input_size**2")
    if x_flat.dtype not in (jnp.float32, jnp.bfloat16):
        x_flat = x_flat.astype(f32)

    # Time embedding (tiny) computed once here; its layer-0 contribution is folded
    # into an effective bias:  cat([x, te]) @ W0 == x @ W0x + (te @ W0t + b0).
    t_arr = jnp.asarray(t, f32).reshape(-1, 1)              # t.view(-1, 1)
    Bt = t_arr.shape[0]
    if Bt not in (1, B):
        raise ValueError(f"t must have 1 or {B} elements, got {Bt}")
    te = jnp.sin(t_arr * params["tw1"] + params["tb1"])     # Linear(1,H) + sin
    te = te @ params["tw2"] + params["tb2"]                 # Linear(H,H)  -> (Bt, H)
    b0_rows = jnp.dot(te.astype(bf16), params["w0t"].astype(bf16),
                      preferred_element_type=f32) + params["b0"]     # (Bt, hidden)
    rowwise_b0 = Bt != 1   # scalar t -> (1, HP) resident constant (t_embed.expand path)

    # Lane-dense padded parameter shapes (exact: zero pads + ReLU(0)=0).
    HP = _round_up(hidden, 128)
    NP = _round_up(num_classes, 128)
    D = _round_up(input_dim, 128)

    TB, TK, vmem_limit = _plan(B, D, HP, NP, rowwise_b0, single_buffer)
    NK = pl.cdiv(D, TK)
    KP = NK * TK

    def pad2(a, r, c):
        return jnp.pad(a, ((0, r - a.shape[0]), (0, c - a.shape[1])))

    # x streams as-is (no pad / cast / batch-pad copy) whenever its feature dim
    # already matches the K tiling (true for input_dim % 128 == 0, resident w0).
    x_in = x_flat if x_flat.shape[1] == KP else pad2(x_flat, B, KP)
    w0_p = pad2(params["w0x"], KP, HP).astype(bf16)
    w1_p = pad2(params["w1"], HP, HP).astype(bf16)
    w2_p = pad2(params["w2"], HP, HP).astype(bf16)
    wo_p = pad2(params["wo"], HP, NP).astype(bf16)
    b1_p = pad2(params["b1"], 1, HP).astype(f32)
    b2_p = pad2(params["b2"], 1, HP).astype(f32)
    bo_p = pad2(params["bo"], 1, NP).astype(f32)

    if rowwise_b0:                                   # per-example t: stream per row (bf16)
        b0_in = pad2(b0_rows, B, HP).astype(bf16)
        b0_spec = pl.BlockSpec((TB, HP), lambda i, k: (i, 0))
    else:                                            # scalar t: VMEM-resident constant
        b0_in = pad2(b0_rows, 1, HP).astype(f32)
        b0_spec = _const_spec((1, HP), single_buffer)

    if NK == 1:
        w0_spec = _const_spec((TK, HP), single_buffer)     # fully resident fast path
    else:
        w0_spec = pl.BlockSpec((TK, HP), lambda i, k: (k, 0))

    out = pl.pallas_call(
        latent_mlp_kernel,
        out_shape=jax.ShapeDtypeStruct((B, NP), bf16),     # bf16 out: .half() semantics
        grid=(pl.cdiv(B, TB), NK),
        in_specs=[
            pl.BlockSpec((TB, TK), lambda i, k: (i, k)),   # x tile (ragged B clamped)
            b0_spec,                                       # folded layer-0 bias
            w0_spec,                                       # w0x (resident or K-streamed)
            _const_spec((HP, HP), single_buffer),          # w1
            _const_spec((1, HP), single_buffer),           # b1
            _const_spec((HP, HP), single_buffer),          # w2
            _const_spec((1, HP), single_buffer),           # b2
            _const_spec((HP, NP), single_buffer),          # wo
            _const_spec((1, NP), single_buffer),           # bo
        ],
        out_specs=pl.BlockSpec((TB, NP), lambda i, k: (i, 0)),
        scratch_shapes=[pltpu.VMEM((TB, HP), f32)],        # layer-0 accumulator
        compiler_params=pltpu.CompilerParams(
            dimension_semantics=("parallel", "arbitrary"),
            vmem_limit_bytes=vmem_limit,
        ),
    )(x_in, b0_in, w0_p, w1_p, b1_p, w2_p, b2_p, wo_p, bo_p)

    return out[:, :num_classes]


def latent_mlp_forward(x, t, params, num_classes):
    return _latent_mlp_forward_impl(x, t, params, num_classes, _single_buffer_ok())


# ---------------------------------------------------------------------- reference
def latent_mlp_reference(x, t, params):
    """Pure-JAX reference (bf16 matmul inputs, f32 accumulate)."""
    f32, bf16 = jnp.float32, jnp.bfloat16
    B = x.shape[0]
    x_flat = x.reshape(B, -1).astype(f32)
    t_arr = jnp.asarray(t, f32).reshape(-1, 1)
    te = jnp.sin(t_arr * params["tw1"] + params["tb1"]) @ params["tw2"] + params["tb2"]
    if te.shape[0] == 1:
        te = jnp.broadcast_to(te, (B, te.shape[1]))

    def mm(a, b):
        return jnp.dot(a.astype(bf16), b.astype(bf16), preferred_element_type=f32)

    h = jnp.concatenate([x_flat, te], axis=1)
    w0 = jnp.concatenate([params["w0x"], params["w0t"]], axis=0)
    h = jnp.maximum(mm(h, w0) + params["b0"], 0.0)
    h = jnp.maximum(mm(h, params["w1"]) + params["b1"], 0.0)
    h = jnp.maximum(mm(h, params["w2"]) + params["b2"], 0.0)
    return mm(h, params["wo"]) + params["bo"]


if __name__ == "__main__":
    B, C, S = 2, 4, 16          # batch, input_channels, input_size
    hidden_dim = 32
    num_classes = 10

    key = jax.random.PRNGKey(0)
    kx, kp = jax.random.split(key)
    x = jax.random.normal(kx, (B, C, S, S), dtype=jnp.float32)   # NCHW, like PyTorch
    t = 0.5                                                      # scalar diffusion timestep

    params = init_params(kp, C, S, hidden_dim, num_classes)

    out = latent_mlp_forward(x, t, params, num_classes)
    out = jax.block_until_ready(out)

    ref = latent_mlp_reference(x, t, params)
    assert out.shape == (B, num_classes)
    assert jnp.allclose(out.astype(jnp.float32), ref, atol=2e-2, rtol=2e-2), \
        "Pallas output mismatch vs JAX reference"

    print("KERNEL_OK")
</pallas_src>

<mosaic_0001>
module attributes {stable_mosaic.version = 11 : i64} {
  func.func @_probe_kernel(%arg0: i32, %arg1: i32, %arg2: memref<8x128xf32, #tpu.memory_space<vmem>>, %arg3: memref<8x128xf32, #tpu.memory_space<vmem>>) attributes {dimension_semantics = [#tpu.dimension_semantics<arbitrary>, #tpu.dimension_semantics<arbitrary>], iteration_bounds = array<i64: 1, 2>, scalar_prefetch = 0 : i64, scratch_operands = 0 : i64, tpu.core_type = #tpu.core_type<tc>, window_params = [{pipeline_mode = #tpu.pipeline_mode<synchronous>, transform_indices = @transform_0, window_bounds = array<i64: 8, 128>}, {pipeline_mode = #tpu.pipeline_mode<synchronous>, transform_indices = @transform_1, window_bounds = array<i64: 8, 128>}]} {
    %c0 = arith.constant 0 : index
    %c0_0 = arith.constant 0 : index
    %0 = vector.load %arg2[%c0, %c0_0] : memref<8x128xf32, #tpu.memory_space<vmem>>, vector<8x128xf32>
    %cst = arith.constant 1.000000e+00 : f32
    %1 = vector.broadcast %cst : f32 to vector<8x128xf32>
    %2 = arith.addf %0, %1 : vector<8x128xf32>
    %c0_1 = arith.constant 0 : index
    %c0_2 = arith.constant 0 : index
    %3 = vector.load %arg3[%c0_1, %c0_2] : memref<8x128xf32, #tpu.memory_space<vmem>>, vector<8x128xf32>
    tpu.vector_store %arg3[%c0_1, %c0_2], %2 {strides = array<i32>} : memref<8x128xf32, #tpu.memory_space<vmem>>, vector<8x128xf32>,
    return
  }
  func.func @transform_0(%arg0: i32, %arg1: i32) -> (i32, i32) {
    %c0_i32 = arith.constant 0 : i32
    %c0_i32_0 = arith.constant 0 : i32
    %c0_i32_1 = arith.constant 0 : i32
    return %c0_i32, %c0_i32_0 : i32, i32
  }
  func.func @transform_1(%arg0: i32, %arg1: i32) -> (i32, i32) {
    %c0_i32 = arith.constant 0 : i32
    %c0_i32_0 = arith.constant 0 : i32
    %c0_i32_1 = arith.constant 0 : i32
    return %c0_i32, %c0_i32_0 : i32, i32
  }
}

module attributes {stable_mosaic.version = 11 : i64} {
  func.func @latent_mlp_kernel(%arg0: i32, %arg1: i32, %arg2: memref<8x1024xf32, #tpu.memory_space<vmem>>, %arg3: memref<1x128xf32, #tpu.memory_space<vmem>>, %arg4: memref<1024x128xbf16, #tpu.memory_space<vmem>>, %arg5: memref<128x128xbf16, #tpu.memory_space<vmem>>, %arg6: memref<1x128xf32, #tpu.memory_space<vmem>>, %arg7: memref<128x128xbf16, #tpu.memory_space<vmem>>, %arg8: memref<1x128xf32, #tpu.memory_space<vmem>>, %arg9: memref<128x128xbf16, #tpu.memory_space<vmem>>, %arg10: memref<1x128xf32, #tpu.memory_space<vmem>>, %arg11: memref<8x128xbf16, #tpu.memory_space<vmem>>, %arg12: memref<8x128xf32, #tpu.memory_space<vmem>>) attributes {dimension_semantics = [#tpu.dimension_semantics<parallel>, #tpu.dimension_semantics<arbitrary>], iteration_bounds = array<i64: 1, 1>, scalar_prefetch = 0 : i64, scratch_operands = 1 : i64, tpu.core_type = #tpu.core_type<tc>, window_params = [{transform_indices = @transform_0, window_bounds = array<i64: 8, 1024>}, {pipeline_mode = #tpu.pipeline_mode<synchronous>, transform_indices = @transform_1, window_bounds = array<i64: 1, 128>}, {pipeline_mode = #tpu.pipeline_mode<synchronous>, transform_indices = @transform_2, window_bounds = array<i64: 1024, 128>}, {pipeline_mode = #tpu.pipeline_mode<synchronous>, transform_indices = @transform_3, window_bounds = array<i64: 128, 128>}, {pipeline_mode = #tpu.pipeline_mode<synchronous>, transform_indices = @transform_4, window_bounds = array<i64: 1, 128>}, {pipeline_mode = #tpu.pipeline_mode<synchronous>, transform_indices = @transform_5, window_bounds = array<i64: 128, 128>}, {pipeline_mode = #tpu.pipeline_mode<synchronous>, transform_indices = @transform_6, window_bounds = array<i64: 1, 128>}, {pipeline_mode = #tpu.pipeline_mode<synchronous>, transform_indices = @transform_7, window_bounds = array<i64: 128, 128>}, {pipeline_mode = #tpu.pipeline_mode<synchronous>, transform_indices = @transform_8, window_bounds = array<i64: 1, 128>}, {transform_indices = @transform_9, window_bounds = array<i64: 8, 128>}]} {
    %c0_i32 = arith.constant 0 : i32
    %0 = arith.cmpi eq, %arg1, %c0_i32 : i32
    %1 = arith.extui %0 : i1 to i32
    %c0_i32_0 = arith.constant 0 : i32
    %2 = arith.cmpi ne, %1, %c0_i32_0 : i32
    scf.if %2 {
      %cst_10 = arith.constant 0.000000e+00 : f32
      %13 = vector.broadcast %cst_10 : f32 to vector<8x128xf32>
      %c0_11 = arith.constant 0 : index
      %c0_12 = arith.constant 0 : index
      %14 = vector.load %arg12[%c0_11, %c0_12] : memref<8x128xf32, #tpu.memory_space<vmem>>, vector<8x128xf32>
      tpu.vector_store %arg12[%c0_11, %c0_12], %13 {strides = array<i32>} : memref<8x128xf32, #tpu.memory_space<vmem>>, vector<8x128xf32>,
    } else {
    }
    %c0 = arith.constant 0 : index
    %c0_1 = arith.constant 0 : index
    %3 = vector.load %arg12[%c0, %c0_1] : memref<8x128xf32, #tpu.memory_space<vmem>>, vector<8x128xf32>
    %c0_2 = arith.constant 0 : index
    %c0_3 = arith.constant 0 : index
    %4 = vector.load %arg2[%c0_2, %c0_3] : memref<8x1024xf32, #tpu.memory_space<vmem>>, vector<8x1024xf32>
    %5 = arith.truncf %4 : vector<8x1024xf32> to vector<8x1024xbf16>
    %c0_4 = arith.constant 0 : index
    %c0_5 = arith.constant 0 : index
    %6 = vector.load %arg4[%c0_4, %c0_5] : memref<1024x128xbf16, #tpu.memory_space<vmem>>, vector<1024x128xbf16>
    %cst = arith.constant dense<0.000000e+00> : vector<8x128xf32>
    %7 = tpu.matmul %5, %6, %cst {dimension_numbers = #tpu.dot_dimension_numbers<[1], [0], [0], [1], [0, 0, 1, 1], [], []>} : vector<8x1024xbf16>, vector<1024x128xbf16>, vector<8x128xf32> -> vector<8x128xf32>
    %8 = arith.addf %3, %7 : vector<8x128xf32>
    %c0_6 = arith.constant 0 : index
    %c0_7 = arith.constant 0 : index
    %9 = vector.load %arg12[%c0_6, %c0_7] : memref<8x128xf32, #tpu.memory_space<vmem>>, vector<8x128xf32>
    tpu.vector_store %arg12[%c0_6, %c0_7], %8 {strides = array<i32>} : memref<8x128xf32, #tpu.memory_space<vmem>>, vector<8x128xf32>,
    %c0_i32_8 = arith.constant 0 : i32
    %10 = arith.cmpi eq, %arg1, %c0_i32_8 : i32
    %11 = arith.extui %10 : i1 to i32
    %c0_i32_9 = arith.constant 0 : i32
    %12 = arith.cmpi ne, %11, %c0_i32_9 : i32
    scf.if %12 {
      %c0_10 = arith.constant 0 : index
      %c0_11 = arith.constant 0 : index
      %13 = vector.load %arg12[%c0_10, %c0_11] : memref<8x128xf32, #tpu.memory_space<vmem>>, vector<8x128xf32>
      %c0_12 = arith.constant 0 : index
      %c0_13 = arith.constant 0 : index
      %14 = vector.load %arg3[%c0_12, %c0_13] : memref<1x128xf32, #tpu.memory_space<vmem>>, vector<1x128xf32>
      %15 = vector.broadcast %14 : vector<1x128xf32> to vector<8x128xf32>
      %16 = arith.addf %13, %15 : vector<8x128xf32>
      %cst_14 = arith.constant 0.000000e+00 : f32
      %17 = vector.broadcast %cst_14 : f32 to vector<8x128xf32>
      %18 = arith.maximumf %16, %17 : vector<8x128xf32>
      %19 = arith.truncf %18 : vector<8x128xf32> to vector<8x128xbf16>
      %c0_15 = arith.constant 0 : index
      %c0_16 = arith.constant 0 : index
      %20 = vector.load %arg5[%c0_15, %c0_16] : memref<128x128xbf16, #tpu.memory_space<vmem>>, vector<128x128xbf16>
      %cst_17 = arith.constant dense<0.000000e+00> : vector<8x128xf32>
      %21 = tpu.matmul %19, %20, %cst_17 {dimension_numbers = #tpu.dot_dimension_numbers<[1], [0], [0], [1], [0, 0, 1, 1], [], []>} : vector<8x128xbf16>, vector<128x128xbf16>, vector<8x128xf32> -> vector<8x128xf32>
      %c0_18 = arith.constant 0 : index
      %c0_19 = arith.constant 0 : index
      %22 = vector.load %arg6[%c0_18, %c0_19] : memref<1x128xf32, #tpu.memory_space<vmem>>, vector<1x128xf32>
      %23 = vector.broadcast %22 : vector<1x128xf32> to vector<8x128xf32>
      %24 = arith.addf %21, %23 : vector<8x128xf32>
      %cst_20 = arith.constant 0.000000e+00 : f32
      %25 = vector.broadcast %cst_20 : f32 to vector<8x128xf32>
      %26 = arith.maximumf %24, %25 : vector<8x128xf32>
      %27 = arith.truncf %26 : vector<8x128xf32> to vector<8x128xbf16>
      %c0_21 = arith.constant 0 : index
      %c0_22 = arith.constant 0 : index
      %28 = vector.load %arg7[%c0_21, %c0_22] : memref<128x128xbf16, #tpu.memory_space<vmem>>, vector<128x128xbf16>
      %cst_23 = arith.constant dense<0.000000e+00> : vector<8x128xf32>
      %29 = tpu.matmul %27, %28, %cst_23 {dimension_numbers = #tpu.dot_dimension_numbers<[1], [0], [0], [1], [0, 0, 1, 1], [], []>} : vector<8x128xbf16>, vector<128x128xbf16>, vector<8x128xf32> -> vector<8x128xf32>
      %c0_24 = arith.constant 0 : index
      %c0_25 = arith.constant 0 : index
      %30 = vector.load %arg8[%c0_24, %c0_25] : memref<1x128xf32, #tpu.memory_space<vmem>>, vector<1x128xf32>
      %31 = vector.broadcast %30 : vector<1x128xf32> to vector<8x128xf32>
      %32 = arith.addf %29, %31 : vector<8x128xf32>
      %cst_26 = arith.constant 0.000000e+00 : f32
      %33 = vector.broadcast %cst_26 : f32 to vector<8x128xf32>
      %34 = arith.maximumf %32, %33 : vector<8x128xf32>
      %35 = arith.truncf %34 : vector<8x128xf32> to vector<8x128xbf16>
      %c0_27 = arith.constant 0 : index
      %c0_28 = arith.constant 0 : index
      %36 = vector.load %arg9[%c0_27, %c0_28] : memref<128x128xbf16, #tpu.memory_space<vmem>>, vector<128x128xbf16>
      %cst_29 = arith.constant dense<0.000000e+00> : vector<8x128xf32>
      %37 = tpu.matmul %35, %36, %cst_29 {dimension_numbers = #tpu.dot_dimension_numbers<[1], [0], [0], [1], [0, 0, 1, 1], [], []>} : vector<8x128xbf16>, vector<128x128xbf16>, vector<8x128xf32> -> vector<8x128xf32>
      %c0_30 = arith.constant 0 : index
      %c0_31 = arith.constant 0 : index
      %38 = vector.load %arg10[%c0_30, %c0_31] : memref<1x128xf32, #tpu.memory_space<vmem>>, vector<1x128xf32>
      %39 = vector.broadcast %38 : vector<1x128xf32> to vector<8x128xf32>
      %40 = arith.addf %37, %39 : vector<8x128xf32>
      %41 = arith.truncf %40 : vector<8x128xf32> to vector<8x128xbf16>
      %c0_32 = arith.constant 0 : index
      %c0_33 = arith.constant 0 : index
      %42 = vector.load %arg11[%c0_32, %c0_33] : memref<8x128xbf16, #tpu.memory_space<vmem>>, vector<8x128xbf16>
      tpu.vector_store %arg11[%c0_32, %c0_33], %41 {strides = array<i32>} : memref<8x128xbf16, #tpu.memory_space<vmem>>, vector<8x128xbf16>,
    } else {
    }
    return
  }
  func.func @transform_0(%arg0: i32, %arg1: i32) -> (i32, i32) {
    %c0_i32 = arith.constant 0 : i32
    return %arg0, %arg1 : i32, i32
  }
  func.func @transform_1(%arg0: i32, %arg1: i32) -> (i32, i32) {
    %c0_i32 = arith.constant 0 : i32
    %c0_i32_0 = arith.constant 0 : i32
    %c0_i32_1 = arith.constant 0 : i32
    return %c0_i32, %c0_i32_0 : i32, i32
  }
  func.func @transform_2(%arg0: i32, %arg1: i32) -> (i32, i32) {
    %c0_i32 = arith.constant 0 : i32
    %c0_i32_0 = arith.constant 0 : i32
    %c0_i32_1 = arith.constant 0 : i32
    return %c0_i32, %c0_i32_0 : i32, i32
  }
  func.func @transform_3(%arg0: i32, %arg1: i32) -> (i32, i32) {
    %c0_i32 = arith.constant 0 : i32
    %c0_i32_0 = arith.constant 0 : i32
    %c0_i32_1 = arith.constant 0 : i32
    return %c0_i32, %c0_i32_0 : i32, i32
  }
  func.func @transform_4(%arg0: i32, %arg1: i32) -> (i32, i32) {
    %c0_i32 = arith.constant 0 : i32
    %c0_i32_0 = arith.constant 0 : i32
    %c0_i32_1 = arith.constant 0 : i32
    return %c0_i32, %c0_i32_0 : i32, i32
  }
  func.func @transform_5(%arg0: i32, %arg1: i32) -> (i32, i32) {
    %c0_i32 = arith.constant 0 : i32
    %c0_i32_0 = arith.constant 0 : i32
    %c0_i32_1 = arith.constant 0 : i32
    return %c0_i32, %c0_i32_0 : i32, i32
  }
  func.func @transform_6(%arg0: i32, %arg1: i32) -> (i32, i32) {
    %c0_i32 = arith.constant 0 : i32
    %c0_i32_0 = arith.constant 0 : i32
    %c0_i32_1 = arith.constant 0 : i32
    return %c0_i32, %c0_i32_0 : i32, i32
  }
  func.func @transform_7(%arg0: i32, %arg1: i32) -> (i32, i32) {
    %c0_i32 = arith.constant 0 : i32
    %c0_i32_0 = arith.constant 0 : i32
    %c0_i32_1 = arith.constant 0 : i32
    return %c0_i32, %c0_i32_0 : i32, i32
  }
  func.func @transform_8(%arg0: i32, %arg1: i32) -> (i32, i32) {
    %c0_i32 = arith.constant 0 : i32
    %c0_i32_0 = arith.constant 0 : i32
    %c0_i32_1 = arith.constant 0 : i32
    return %c0_i32, %c0_i32_0 : i32, i32
  }
  func.func @transform_9(%arg0: i32, %arg1: i32) -> (i32, i32) {
    %c0_i32 = arith.constant 0 : i32
    %c0_i32_0 = arith.constant 0 : i32
    return %arg0, %c0_i32 : i32, i32
  }
}

</mosaic_0001>

<bundles_post_ra>
// kernel: tpu_custom_call.1
= control target key start
LH: loop header
LB: loop body
LE: loop exit
PB: predicated region body
PF: predicated region fallthrough
CT: control target
= control target key end

     0   :  { %6 = vsyncpa [#allocation3], 0  ;;  %s299_s0 = inlined_call_operand.hbm [shape: f32[8,128], index: 0, kind: input, shape index: {}]   ;;  %s300_s1 = inlined_call_operand.hbm [shape: f32[8,128], index: 1, kind: output, shape index: {}]  }
   0x1   :  { %7 = vsyncpa [#allocation4], 0  ;;  %s282_s6 = smov 0  }
   0x2 LB: > { %s161_s7 = sadd.s32 4294967295, %s268_s6   ;;  %p162_p0 = scmp.ge.s32.totalorder %s268_s6, 1  ;;  %s268_s6 = sphi %s282_s6, %s13_s6  }
   0x3   : > { %p72_p1 = scmp.lt.s32.totalorder %s268_s6, 3  ;;  %s84_s10 = sshll.u32 %s299_s0, 4  ;;  %s85_s10 = int_to_ptr.hbm [resolvable:$true] %s84_s10 }
   0x4   : > { %p182_p3 = scmp.eq.s32.totalorder %s161_s7, 0  ;;  %s270_s11 = smov [#allocation2]  }
   0x5   : > { %p73_p2 = pnand %p162_p0, %p72_p1  ;;  %s86_s12 = sshll.u32 %s270_s11, 4  ;;  %s87_s12 = int_to_ptr.vmem [resolvable:$true] %s86_s12 }
   0x7   : > { %p178_p4 = pneg %p73_p2  ;;  %99 = sbr.rel (%p73_p2) target bundleno = 20 (0x14), region = 24 }
   0x9   : > { %p179_p5 = pnand %p182_p3, %p178_p4 }
   0xb   : > { %181 = dma.hbm_to_vmem [thread:$0]  (!%p179_p5), %s85_s10, 128, %s87_s12, [#allocation3]  }
   0xc   : > { %259 = dma.done.wait (%p182_p3), [#allocation3], 128  }
   0xd   : > { %261 = vsyncadd (%p182_p3), [#allocation3], 4294967168  ;;  %s271_s13 = smov [#allocation5]   ;;  %s121_s17 = sshll.u32 %s300_s1, 4  ;;  %v110_v0 = vld [vmem:[#allocation2] sm:$0xff]  ;;  %s122_s17 = int_to_ptr.hbm [resolvable:$true] %s121_s17 }
   0xe   : > { %s119_s14 = sshll.u32 %s271_s13, 4  ;;  %p184_p6 = scmp.eq.s32.totalorder %s161_s7, 1  ;;  %v111_v1 = vadd.f32 1.0, %v110_v0  ;;  %s120_s14 = int_to_ptr.vmem [resolvable:$true] %s119_s14 }
  0x10   : > { %112 = vst [vmem:[#allocation5] sm:$0xff] %v111_v1 }
  0x11   : > { %175 = dma.vmem_to_hbm [thread:$0]  (%p184_p6), %s120_s14, 128, %s122_s17, [#allocation4]  }
  0x12   : > { %263 = dma.done.wait (%p184_p6), [#allocation4], 128  }
  0x13   : > { %265 = vsyncadd (%p184_p6), [#allocation4], 4294967168 }
  0x14 PF: > { %s13_s6 = sadd.s32 1, %s268_s6  }
  0x15   : > { %p10_p7 = scmp.ge.s32.totalorder %s13_s6, 4  }
  0x17   :  { %12 = sbr.rel (!%p10_p7) target bundleno = 2 (0x2), region = 53 }
  0x1c   :  { %135 = vsyncpa [#allocation3], 1 }
  0x1d   :  { %137 = vsyncpa [#allocation3 + $0x1], 1 }
  0x1e   :  { %138 = vsyncpa [#allocation4], 1 }
  0x1f   :  { %140 = vsyncpa [#allocation4 + $0x1], 1 }

// kernel: _latent_mlp_forward_impl.1
= control target key start
LH: loop header
LB: loop body
LE: loop exit
PB: predicated region body
PF: predicated region fallthrough
CT: control target
= control target key end

     0   :  { %14 = vsyncpa [#allocation4], 0  ;;  %vm973_vm0 = vcmask 1040384   ;;  %vm977_vm1 = vcmask 1041409   ;;  %vm981_vm2 = vcmask 1042434   ;;  %vm985_vm3 = vcmask 1043459   ;;  %s1844_s0 = inlined_call_operand.vmem [shape: f32[2,1024], index: 0, kind: input, shape index: {}]   ;;  %s1845_s1 = inlined_call_operand.vmem [shape: f32[1,128], index: 1, kind: input, shape index: {}]   ;;  %s1846_s2 = inlined_call_operand.vmem [shape: bf16[1024,128], index: 2, kind: input, shape index: {}]   ;;  %s1847_s3 = inlined_call_operand.vmem [shape: bf16[128,128], index: 3, kind: input, shape index: {}]   ;;  %s1848_s4 = inlined_call_operand.vmem [shape: f32[1,128], index: 4, kind: input, shape index: {}]   ;;  %s1849_s5 = inlined_call_operand.vmem [shape: bf16[128,128], index: 5, kind: input, shape index: {}]   ;;  %s1850_s6 = inlined_call_operand.vmem [shape: f32[1,128], index: 6, kind: input, shape index: {}]   ;;  %s1851_s7 = inlined_call_operand.vmem [shape: bf16[128,128], index: 7, kind: input, shape index: {}]   ;;  %s1852_s8 = inlined_call_operand.vmem [shape: f32[1,128], index: 8, kind: input, shape index: {}]   ;;  %s1853_s9 = inlined_call_operand.hbm [shape: bf16[2,128], index: 9, kind: output, shape index: {}]  }
   0x1   :  { %v1374_v0 = vld [vmem:[%s1846_s2 + $0x38] sm:$0xff]  ;;  %v1373_v4 = vld [vmem:[%s1846_s2 + $0x30] sm:$0xff]  ;;  %v1372_v8 = vld [vmem:[%s1846_s2 + $0x28] sm:$0xff] }
   0x2   :  { %v1382_v1 = vld [vmem:[%s1846_s2 + $0x78] sm:$0xff]  ;;  %606 = vmatpush.bf16.msra.mxu0 %v1374_v0  ;;  %v1381_v5 = vld [vmem:[%s1846_s2 + $0x70] sm:$0xff]  ;;  %v1380_v9 = vld [vmem:[%s1846_s2 + $0x68] sm:$0xff] }
   0x3   :  { %v1390_v2 = vld [vmem:[%s1846_s2 + $0xb8] sm:$0xff]  ;;  %619 = vmatpush.bf16.msra.mxu1 %v1382_v1  ;;  %v1389_v6 = vld [vmem:[%s1846_s2 + $0xb0] sm:$0xff]  ;;  %v1388_v10 = vld [vmem:[%s1846_s2 + $0xa8] sm:$0xff] }
   0x4   :  { %v1398_v3 = vld [vmem:[%s1846_s2 + $0xf8] sm:$0xff]  ;;  %632 = vmatpush.bf16.msra.mxu2 %v1390_v2  ;;  %v1397_v7 = vld [vmem:[%s1846_s2 + $0xf0] sm:$0xff]  ;;  %v1396_v11 = vld [vmem:[%s1846_s2 + $0xe8] sm:$0xff] }
   0x5   :  { %645 = vmatpush.bf16.msra.mxu3 %v1398_v3  ;;  %v1371_v12 = vld [vmem:[%s1846_s2 + $0x20] sm:$0xff]  ;;  %v1370_v16 = vld [vmem:[%s1846_s2 + $0x18] sm:$0xff]  ;;  %v41_v19 = vld [vmem:[%s1844_s0 + $0x10] sm:$0xff] }
   0x6   :  { %607 = vmatpush.bf16.msra.mxu0 %v1373_v4  ;;  %v1379_v13 = vld [vmem:[%s1846_s2 + $0x60] sm:$0xff]  ;;  %v1378_v17 = vld [vmem:[%s1846_s2 + $0x58] sm:$0xff]  ;;  %v45_v21 = vld [vmem:[%s1844_s0 + $0x30] sm:$0xff]  ;;  %57 = vst [vmem:[#allocation1 + $0x1] ss:$4 sm:$0xff] %v41_v19 }
   0x7   :  { %620 = vmatpush.bf16.msra.mxu1 %v1381_v5  ;;  %v1387_v14 = vld [vmem:[%s1846_s2 + $0xa0] sm:$0xff]  ;;  %v1386_v22 = vld [vmem:[%s1846_s2 + $0x98] sm:$0xff]  ;;  %61 = vst [vmem:[#allocation1 + $0x3] ss:$4 sm:$0xff] %v45_v21  ;;  %v1369_v24 = vld [vmem:[%s1846_s2 + $0x10] sm:$0xff] }
   0x8   :  { %633 = vmatpush.bf16.msra.mxu2 %v1389_v6  ;;  %v1395_v15 = vld [vmem:[%s1846_s2 + $0xe0] sm:$0xff]  ;;  %v1394_v23 = vld [vmem:[%s1846_s2 + $0xd8] sm:$0xff]  ;;  %v1377_v25 = vld [vmem:[%s1846_s2 + $0x50] sm:$0xff] }
   0x9   :  { %646 = vmatpush.bf16.msra.mxu3 %v1397_v7  ;;  %v39_v18 = vld [vmem:[%s1844_s0] sm:$0xff]  ;;  %v1385_v26 = vld [vmem:[%s1846_s2 + $0x90] sm:$0xff]  ;;  %v40_v28 = vld [vmem:[%s1844_s0 + $0x8] sm:$0xff] }
   0xa   :  { %608 = vmatpush.bf16.msra.mxu0 %v1372_v8  ;;  %v43_v20 = vld [vmem:[%s1844_s0 + $0x20] sm:$0xff]  ;;  %55 = vst [vmem:[#allocation1] ss:$4 sm:$0xff] %v39_v18  ;;  %v1393_v27 = vld [vmem:[%s1846_s2 + $0xd0] sm:$0xff]  ;;  %v42_v29 = vld [vmem:[%s1844_s0 + $0x18] sm:$0xff] }
   0xb   :  { %621 = vmatpush.bf16.msra.mxu1 %v1380_v9  ;;  %59 = vst [vmem:[#allocation1 + $0x2] ss:$4 sm:$0xff] %v43_v20  ;;  %v1368_v30 = vld [vmem:[%s1846_s2 + $0x8] sm:$0xff]  ;;  %v1367_v35 = vld [vmem:[%s1846_s2] sm:$0xff]  ;;  %v46_v36 = vld [vmem:[%s1844_s0 + $0x38] sm:$0xff] }
   0xc   :  { %634 = vmatpush.bf16.msra.mxu2 %v1388_v10  ;;  %v1376_v31 = vld [vmem:[%s1846_s2 + $0x48] sm:$0xff]  ;;  %63 = vst [vmem:[#allocation1 + $0x20] ss:$4 sm:$0xff] %v40_v28  ;;  %v1375_v37 = vld [vmem:[%s1846_s2 + $0x40] sm:$0xff]  ;;  %v1406_v41 = vld [vmem:[%s1846_s2 + $0x138] sm:$0xff] }
   0xd   :  { %647 = vmatpush.bf16.msra.mxu3 %v1396_v11  ;;  %v1384_v32 = vld [vmem:[%s1846_s2 + $0x88] sm:$0xff]  ;;  %65 = vst [vmem:[#allocation1 + $0x21] ss:$4 sm:$0xff] %v42_v29  ;;  %v1383_v38 = vld [vmem:[%s1846_s2 + $0x80] sm:$0xff]  ;;  %v1414_v42 = vld [vmem:[%s1846_s2 + $0x178] sm:$0xff] }
   0xe   :  { %609 = vmatpush.bf16.msra.mxu0 %v1371_v12  ;;  %v1392_v33 = vld [vmem:[%s1846_s2 + $0xc8] sm:$0xff]  ;;  %v1391_v40 = vld [vmem:[%s1846_s2 + $0xc0] sm:$0xff]  ;;  %69 = vst [vmem:[#allocation1 + $0x23] ss:$4 sm:$0xff] %v46_v36  ;;  %v1422_v46 = vld [vmem:[%s1846_s2 + $0x1b8] sm:$0xff] }
   0xf   :  { %622 = vmatpush.bf16.msra.mxu1 %v1379_v13  ;;  %v44_v34 = vld [vmem:[%s1844_s0 + $0x28] sm:$0xff]  ;;  %v1430_v47 = vld [vmem:[%s1846_s2 + $0x1f8] sm:$0xff]  ;;  %v1405_v52 = vld [vmem:[%s1846_s2 + $0x130] sm:$0xff] }
  0x10   :  { %635 = vmatpush.bf16.msra.mxu2 %v1387_v14  ;;  %67 = vst [vmem:[#allocation1 + $0x22] ss:$4 sm:$0xff] %v44_v34  ;;  %v1413_v53 = vld [vmem:[%s1846_s2 + $0x170] sm:$0xff]  ;;  %v1404_v56 = vld [vmem:[%s1846_s2 + $0x128] sm:$0xff]  ;;  %v1403_v60 = vld [vmem:[%s1846_s2 + $0x120] sm:$0xff] }
  0x11   :  { %648 = vmatpush.bf16.msra.mxu3 %v1395_v15  ;;  %v1421_v54 = vld [vmem:[%s1846_s2 + $0x1b0] sm:$0xff]  ;;  %v1412_v57 = vld [vmem:[%s1846_s2 + $0x168] sm:$0xff]  ;;  %v1411_v61 = vld [vmem:[%s1846_s2 + $0x160] sm:$0xff] }
  0x12   :  { %610 = vmatpush.bf16.msra.mxu0 %v1370_v16  ;;  %v72_v39 = vld.sshfl [vmem:[#allocation1 + $0x10] sm:$0xff pattern:$0x73625140]  ;;  %v70_v43 = vld.sshfl [vmem:[#allocation1] sm:$0xff pattern:$0x73625140] }
  0x13   :  { %623 = vmatpush.bf16.msra.mxu1 %v1378_v17  ;;  %v73_v44 = vld.sshfl [vmem:[#allocation1 + $0x18] sm:$0xff pattern:$0x73625140]  ;;  %v71_v45 = vld.sshfl [vmem:[#allocation1 + $0x8] sm:$0xff pattern:$0x73625140]  ;;  %v88_v48 = vpack.c.bf16 %v72_v39, %v72_v39  ;;  %v86_v49 = vpack.c.bf16 %v70_v43, %v70_v43 }
  0x14   :  { %636 = vmatpush.bf16.msra.mxu2 %v1386_v22  ;;  %v89_v50 = vpack.c.bf16 %v73_v44, %v73_v44  ;;  %v87_v51 = vpack.c.bf16 %v71_v45, %v71_v45  ;;  %v1429_v55 = vld [vmem:[%s1846_s2 + $0x1f0] sm:$0xff]  ;;  %v1420_v58 = vld [vmem:[%s1846_s2 + $0x1a8] sm:$0xff]  ;;  %v1419_v62 = vld [vmem:[%s1846_s2 + $0x1a0] sm:$0xff] }
  0x15   :  { %649 = vmatpush.bf16.msra.mxu3 %v1394_v23  ;;  %v1428_v59 = vld [vmem:[%s1846_s2 + $0x1e8] sm:$0xff]  ;;  %v1427_v63 = vld [vmem:[%s1846_s2 + $0x1e0] sm:$0xff]  ;;  %v1402_v0 = vld [vmem:[%s1846_s2 + $0x118] sm:$0xff] }
  0x16   :  { %611 = vmatpush.bf16.msra.mxu0 %v1369_v24  ;;  %v1410_v1 = vld [vmem:[%s1846_s2 + $0x158] sm:$0xff]  ;;  %v1401_v4 = vld [vmem:[%s1846_s2 + $0x110] sm:$0xff]  ;;  %v1400_v8 = vld [vmem:[%s1846_s2 + $0x108] sm:$0xff] }
  0x17   :  { %624 = vmatpush.bf16.msra.mxu1 %v1377_v25  ;;  %v1418_v2 = vld [vmem:[%s1846_s2 + $0x198] sm:$0xff]  ;;  %v1409_v5 = vld [vmem:[%s1846_s2 + $0x150] sm:$0xff]  ;;  %v1408_v9 = vld [vmem:[%s1846_s2 + $0x148] sm:$0xff] }
  0x18   :  { %637 = vmatpush.bf16.msra.mxu2 %v1385_v26  ;;  %v1426_v3 = vld [vmem:[%s1846_s2 + $0x1d8] sm:$0xff]  ;;  %v1417_v6 = vld [vmem:[%s1846_s2 + $0x190] sm:$0xff]  ;;  %v1416_v10 = vld [vmem:[%s1846_s2 + $0x188] sm:$0xff] }
  0x19   :  { %650 = vmatpush.bf16.msra.mxu3 %v1393_v27  ;;  %v1425_v7 = vld [vmem:[%s1846_s2 + $0x1d0] sm:$0xff]  ;;  %v1424_v11 = vld [vmem:[%s1846_s2 + $0x1c8] sm:$0xff]  ;;  %v1399_v12 = vld [vmem:[%s1846_s2 + $0x100] sm:$0xff] }
  0x1a   :  { %612 = vmatpush.bf16.msra.mxu0 %v1368_v30  ;;  %v1407_v13 = vld [vmem:[%s1846_s2 + $0x140] sm:$0xff]  ;;  %v75_v17 = vld.sshfl [vmem:[#allocation1 + $0x28] sm:$0xff pattern:$0x73625140]  ;;  %v1438_v24 = vld [vmem:[%s1847_s3 + $0x38] sm:$0xff] }
  0x1b   :  { %625 = vmatpush.bf16.msra.mxu1 %v1376_v31  ;;  %v1415_v14 = vld [vmem:[%s1846_s2 + $0x180] sm:$0xff]  ;;  %v76_v18 = vld.sshfl [vmem:[#allocation1 + $0x30] sm:$0xff pattern:$0x73625140]  ;;  %v91_v21 = vpack.c.bf16 %v75_v17, %v75_v17  ;;  %v1436_v26 = vld [vmem:[%s1847_s3 + $0x28] sm:$0xff] }
  0x1c   :  { %638 = vmatpush.bf16.msra.mxu2 %v1384_v32  ;;  %v1423_v15 = vld [vmem:[%s1846_s2 + $0x1c0] sm:$0xff]  ;;  %v77_v19 = vld.sshfl [vmem:[#allocation1 + $0x38] sm:$0xff pattern:$0x73625140]  ;;  %v92_v22 = vpack.c.bf16 %v76_v18, %v76_v18  ;;  %v1437_v25 = vld [vmem:[%s1847_s3 + $0x30] sm:$0xff] }
  0x1d   :  { %651 = vmatpush.bf16.msra.mxu3 %v1392_v33  ;;  %v74_v16 = vld.sshfl [vmem:[#allocation1 + $0x20] sm:$0xff pattern:$0x73625140]  ;;  %v93_v23 = vpack.c.bf16 %v77_v19, %v77_v19  ;;  %v1434_v28 = vld [vmem:[%s1847_s3 + $0x18] sm:$0xff]  ;;  %v1433_v31 = vld [vmem:[%s1847_s3 + $0x10] sm:$0xff] }
  0x1e   :  { %613 = vmatpush.bf16.msra.mxu0 %v1367_v35  ;;  %v90_v20 = vpack.c.bf16 %v74_v16, %v74_v16  ;;  %v1435_v27 = vld [vmem:[%s1847_s3 + $0x20] sm:$0xff]  ;;  %v1432_v33 = vld [vmem:[%s1847_s3 + $0x8] sm:$0xff] }
  0x1f   :  { %626 = vmatpush.bf16.msra.mxu1 %v1375_v37  ;;  %v1431_v37 = vld [vmem:[%s1847_s3] sm:$0xff]  ;;  %v1444_v43 = vld [vmem:[%s1849_s5 + $0x28] sm:$0xff] }
  0x20   :  { %639 = vmatpush.bf16.msra.mxu2 %v1383_v38  ;;  %v1443_v45 = vld [vmem:[%s1849_s5 + $0x20] sm:$0xff] }
  0x21   :  { %652 = vmatpush.bf16.msra.mxu3 %v1391_v40  ;;  %614 = vmatmul.bf16.vlgmr.msra.gmra.mxu0 %v86_v49  ;;  %v1446_v40 = vld [vmem:[%s1849_s5 + $0x38] sm:$0xff]  ;;  %v1447_v16 = vld [vmem:[%s1851_s7] sm:$0xff] }
  0x22   :  { %658 = vmatpush.bf16.msrb.mxu0 %v1406_v41  ;;  %627 = vmatmul.bf16.vlgmr.msra.gmra.mxu1 %v87_v51  ;;  %v1445_v41 = vld [vmem:[%s1849_s5 + $0x30] sm:$0xff]  ;;  %v1442_v49 = vld [vmem:[%s1849_s5 + $0x18] sm:$0xff]  ;;  %v1460_v17 = vld [vmem:[%s1850_s6] ss:$0 sm:$0xff] }
  0x23   :  { %671 = vmatpush.bf16.msrb.mxu1 %v1414_v42  ;;  %640 = vmatmul.bf16.vlgmr.msra.gmra.mxu2 %v88_v48  ;;  %v1441_v51 = vld [vmem:[%s1849_s5 + $0x10] sm:$0xff] }
  0x24   :  { %684 = vmatpush.bf16.msrb.mxu2 %v1422_v46  ;;  %653 = vmatmul.bf16.vlgmr.msra.gmra.mxu3 %v89_v50 }
  0x25   :  { %697 = vmatpush.bf16.msrb.mxu3 %v1430_v47 }
  0x26   :  { %659 = vmatpush.bf16.msrb.mxu0 %v1405_v52 }
  0x27   :  { %672 = vmatpush.bf16.msrb.mxu1 %v1413_v53 }
  0x28   :  { %685 = vmatpush.bf16.msrb.mxu2 %v1421_v54 }
  0x29   :  { %698 = vmatpush.bf16.msrb.mxu3 %v1429_v55 }
  0x2a   :  { %660 = vmatpush.bf16.msrb.mxu0 %v1404_v56  ;;  %v1458_v56 = vld [vmem:[%s1845_s1] ss:$0 sm:$0xff] }
  0x2b   :  { %673 = vmatpush.bf16.msrb.mxu1 %v1412_v57 }
  0x2c   :  { %686 = vmatpush.bf16.msrb.mxu2 %v1420_v58 }
  0x2d   :  { %699 = vmatpush.bf16.msrb.mxu3 %v1428_v59 }
  0x2e   :  { %661 = vmatpush.bf16.msrb.mxu0 %v1403_v60 }
  0x2f   :  { %674 = vmatpush.bf16.msrb.mxu1 %v1411_v61 }
  0x30   :  { %687 = vmatpush.bf16.msrb.mxu2 %v1419_v62 }
  0x31   :  { %700 = vmatpush.bf16.msrb.mxu3 %v1427_v63 }
  0x32   :  { %662 = vmatpush.bf16.msrb.mxu0 %v1402_v0 }
  0x33   :  { %675 = vmatpush.bf16.msrb.mxu1 %v1410_v1  ;;  %v1440_v1 = vld [vmem:[%s1849_s5 + $0x8] sm:$0xff] }
  0x34   :  { %688 = vmatpush.bf16.msrb.mxu2 %v1418_v2  ;;  %v1439_v2 = vld [vmem:[%s1849_s5] sm:$0xff] }
  0x35   :  { %701 = vmatpush.bf16.msrb.mxu3 %v1426_v3  ;;  %v1454_v3 = vld [vmem:[%s1851_s7 + $0x38] sm:$0xff] }
  0x36   :  { %663 = vmatpush.bf16.msrb.mxu0 %v1401_v4  ;;  %v1453_v4 = vld [vmem:[%s1851_s7 + $0x30] sm:$0xff] }
  0x37   :  { %676 = vmatpush.bf16.msrb.mxu1 %v1409_v5  ;;  %v1452_v5 = vld [vmem:[%s1851_s7 + $0x28] sm:$0xff] }
  0x38   :  { %689 = vmatpush.bf16.msrb.mxu2 %v1417_v6  ;;  %v1451_v6 = vld [vmem:[%s1851_s7 + $0x20] sm:$0xff] }
  0x39   :  { %702 = vmatpush.bf16.msrb.mxu3 %v1425_v7  ;;  %v1450_v7 = vld [vmem:[%s1851_s7 + $0x18] sm:$0xff] }
  0x3a   :  { %664 = vmatpush.bf16.msrb.mxu0 %v1400_v8  ;;  %v1449_v8 = vld [vmem:[%s1851_s7 + $0x10] sm:$0xff] }
  0x3b   :  { %677 = vmatpush.bf16.msrb.mxu1 %v1408_v9  ;;  %v1459_v9 = vld [vmem:[%s1848_s4] ss:$0 sm:$0xff] }
  0x3c   :  { %690 = vmatpush.bf16.msrb.mxu2 %v1416_v10 }
  0x3d   :  { %703 = vmatpush.bf16.msrb.mxu3 %v1424_v11 }
  0x3e   :  { %665 = vmatpush.bf16.msrb.mxu0 %v1399_v12 }
  0x3f   :  { %678 = vmatpush.bf16.msrb.mxu1 %v1407_v13 }
  0x40   :  { %691 = vmatpush.bf16.msrb.mxu2 %v1415_v14 }
  0x41   :  { %704 = vmatpush.bf16.msrb.mxu3 %v1423_v15  ;;  %666 = vmatmul.bf16.vlgmr.msrb.gmra.mxu0 %v90_v20  ;;  %v1448_v15 = vld [vmem:[%s1851_s7 + $0x8] sm:$0xff] }
  0x42   :  { %679 = vmatmul.bf16.vlgmr.msrb.gmra.mxu1 %v91_v21  ;;  %791 = vmatpush.bf16.msra.mxu0 %v1438_v24 }
  0x43   :  { %692 = vmatmul.bf16.vlgmr.msrb.gmra.mxu2 %v92_v22  ;;  %874 = vmatpush.bf16.msra.mxu1 %v1446_v40 }
  0x44   :  { %705 = vmatmul.bf16.vlgmr.msrb.gmra.mxu3 %v93_v23  ;;  %957 = vmatpush.bf16.msra.mxu2 %v1454_v3  ;;  %v1461_v23 = vld [vmem:[%s1852_s8] ss:$0 sm:$0xff] }
  0x46   :  { %792 = vmatpush.bf16.msra.mxu0 %v1437_v25 }
  0x47   :  { %875 = vmatpush.bf16.msra.mxu1 %v1445_v41 }
  0x48   :  { %958 = vmatpush.bf16.msra.mxu2 %v1453_v4 }
  0x4a   :  { %793 = vmatpush.bf16.msra.mxu0 %v1436_v26 }
  0x4b   :  { %876 = vmatpush.bf16.msra.mxu1 %v1444_v43 }
  0x4c   :  { %959 = vmatpush.bf16.msra.mxu2 %v1452_v5 }
  0x4e   :  { %794 = vmatpush.bf16.msra.mxu0 %v1435_v27 }
  0x4f   :  { %877 = vmatpush.bf16.msra.mxu1 %v1443_v45 }
  0x50   :  { %960 = vmatpush.bf16.msra.mxu2 %v1451_v6 }
  0x52   :  { %795 = vmatpush.bf16.msra.mxu0 %v1434_v28 }
  0x53   :  { %878 = vmatpush.bf16.msra.mxu1 %v1442_v49 }
  0x54   :  { %961 = vmatpush.bf16.msra.mxu2 %v1450_v7 }
  0x56   :  { %796 = vmatpush.bf16.msra.mxu0 %v1433_v31 }
  0x57   :  { %879 = vmatpush.bf16.msra.mxu1 %v1441_v51 }
  0x58   :  { %962 = vmatpush.bf16.msra.mxu2 %v1449_v8 }
  0x5a   :  { %797 = vmatpush.bf16.msra.mxu0 %v1432_v33 }
  0x5b   :  { %880 = vmatpush.bf16.msra.mxu1 %v1440_v1 }
  0x5c   :  { %963 = vmatpush.bf16.msra.mxu2 %v1448_v15 }
  0x5e   :  { %798 = vmatpush.bf16.msra.mxu0 %v1431_v37 }
  0x5f   :  { %881 = vmatpush.bf16.msra.mxu1 %v1439_v2 }
  0x60   :  { %964 = vmatpush.bf16.msra.mxu2 %v1447_v16 }
  0x9e   :  { %v615_v29 = vpop.f32.mrf.mxu0 }
  0x9f   :  { %v628_v30 = vpop.f32.mrf.mxu1 }
  0xa0   :  { %v629_v42 = vadd.f32 %v628_v30, %v615_v29 }
  0xa6   :  { %v641_v32 = vpop.f32.mrf.mxu2  ;;  %v617_v35 = vpop.f32.mrf.mxu0 }
  0xa7   :  { %v654_v34 = vpop.f32.mrf.mxu3  ;;  %v630_v36 = vpop.f32.mrf.mxu1  ;;  %v642_v44 = vadd.f32 %v641_v32, %v629_v42 }
  0xa9   :  { %v655_v46 = vadd.f32 %v654_v34, %v642_v44 }
  0xae   :  { %v643_v38 = vpop.f32.mrf.mxu2 }
  0xaf   :  { %v656_v39 = vpop.f32.mrf.mxu3 }
  0xbe   :  { %v667_v47 = vpop.f32.mrf.mxu0 }
  0xbf   :  { %v680_v48 = vpop.f32.mrf.mxu1  ;;  %v668_v50 = vadd.f32 %v667_v47, %v655_v46 }
  0xc1   :  { %v681_v52 = vadd.f32 %v680_v48, %v668_v50 }
  0xc6   :  { %v693_v53 = vpop.f32.mrf.mxu2  ;;  %v669_v57 = vpop.f32.mrf.mxu0 }
  0xc7   :  { %v706_v54 = vpop.f32.mrf.mxu3  ;;  %v694_v55 = vadd.f32 %v693_v53, %v681_v52  ;;  %v682_v58 = vpop.f32.mrf.mxu1 }
  0xc9   :  { %v707_v59 = vadd.f32 %v706_v54, %v694_v55 }
  0xcb   :  { %v720_v60 = vadd.f32 %v1458_v56, %v707_v59 }
  0xcd   :  { %v721_v61 = vmax.f32 %v720_v60, 0.0 }
  0xce   :  { %v695_v62 = vpop.f32.mrf.mxu2 }
  0xcf   :  { %v708_v63 = vpop.f32.mrf.mxu3  ;;  %v722_v0 = vpack.c.bf16 %v721_v61, %v721_v61 }
  0xd1   :  { %799 = vmatmul.bf16.vlgmr.msra.gmra.mxu0 %v722_v0 }
 0x14e   :  { %v800_v10 = vpop.f32.mrf.mxu0 }
 0x14f   :  { %v801_v11 = vadd.f32 %v1459_v9, %v800_v10 }
 0x151   :  { %v804_v12 = vmax.f32 %v801_v11, 0.0 }
 0x153   :  { %v805_v13 = vpack.c.bf16 %v804_v12, %v804_v12 }
 0x155   :  { %882 = vmatmul.bf16.vlgmr.msra.gmra.mxu1 %v805_v13 }
 0x156   :  { %v802_v14 = vpop.f32.mrf.mxu0 }
 0x1d2   :  { %v883_v18 = vpop.f32.mrf.mxu1 }
 0x1d3   :  { %v884_v19 = vadd.f32 %v1460_v17, %v883_v18 }
 0x1d5   :  { %v887_v20 = vmax.f32 %v884_v19, 0.0 }
 0x1d7   :  { %v888_v21 = vpack.c.bf16 %v887_v20, %v887_v20 }
 0x1d9   :  { %965 = vmatmul.bf16.vlgmr.msra.gmra.mxu2 %v888_v21 }
 0x1da   :  { %v885_v22 = vpop.f32.mrf.mxu1 }
 0x25c   :  { %v966_v24 = vpop.f32.mrf.mxu2 }
 0x25d   :  { %v967_v25 = vadd.f32 %v1461_v23, %v966_v24 }
 0x25f   :  { %v970_v26 = vpack.c.bf16 %v967_v25, %v967_v25 }
 0x261   :  { %v972_v27 = vrot.slane %v970_v26, 3 }
 0x263   :  { %v976_v28 = vsel %vm973_vm0, %v970_v26, %v972_v27  ;;  %v978_v29 = vsel %vm977_vm1, %v970_v26, %v972_v27  ;;  %v982_v30 = vsel %vm981_vm2, %v970_v26, %v972_v27  ;;  %v986_v31 = vsel %vm985_vm3, %v970_v26, %v972_v27 }
 0x264   :  { %v980_v32 = vrot.slane %v978_v29, 1  ;;  %v984_v33 = vrot.slane %v982_v30, 2  ;;  %v988_v34 = vrot.slane %v986_v31, 3  ;;  %993 = vst [vmem:[#allocation3] sm:$0x1] %v976_v28  ;;  %v968_v35 = vpop.f32.mrf.mxu2 }
 0x266   :  { %994 = vst [vmem:[#allocation3 + $0x1] sm:$0x1] %v980_v32 }
 0x267   :  { %995 = vst [vmem:[#allocation3 + $0x2] sm:$0x1] %v984_v33 }
 0x268   :  { %996 = vst [vmem:[#allocation3 + $0x3] sm:$0x1] %v988_v34 }
 0x269   :  { %1000 = vsyncadd [#allocation4], 48  ;;  %s1003_s8 = sshll.u32 %s1853_s9, 4  ;;  %s1488_s0 = smov [#allocation3]   ;;  %s1004_s8 = int_to_ptr.hbm [resolvable:$true] %s1003_s8 }
 0x26a   :  { %s1001_s28 = sshll.u32 %s1488_s0, 4  ;;  %s1489_s29 = smov 16   ;;  %s1002_s28 = int_to_ptr.vmem [resolvable:$true] %s1001_s28 }
 0x26b   :  { %s1490_s30 = smov 1  }
 0x26c   :  { %1009 = dma.vmem_to_hbm [thread:$0]  %s1002_s28, 16, %s1004_s8, [#allocation4], %s1489_s29, %s1489_s29, %s1490_s30  }
 0x26d   :  { %1486 = dma.done.wait [#allocation4], 64  }
 0x26e   :  { %1487 = vsyncadd [#allocation4], 4294967232 }
 0x26f   :  { %1014 = vsyncpa [#allocation4], 1 }

</bundles_post_ra>
